<compile_context>
chip_gen: v7x
topology: tpu7x:2x2x1
jax: 0.10.0
libtpu: 0.0.40
codegen_flags: <defaults>
</compile_context>

<pallas_src>
import jax
import jax.numpy as jnp
from jax.experimental import pallas as pl
from jax.experimental.pallas import tpu as pltpu

_LANE = 128
_SUB = 8
# Per-channel, per-step block budget (f32 elements, counted after sublane
# padding).  Double-buffered in+out for C=3 is then <= 2*(3+1)*1 MiB = 8 MiB,
# comfortably inside v5e's ~16 MiB default scoped VMEM and v7x's 64 MiB.
_MAX_BLOCK_ELEMS = 1 << 18


def _round_up(x, m):
    return ((x + m - 1) // m) * m


def _conv1x1_tanh_tanh_kernel(params_ref, x_ref, o_ref):
    # params_ref: SMEM f32[(C+1,)] = [w_0 .. w_{C-1}, b]  (scalar-prefetched)
    # aligned path: x_ref VMEM (bn, C, ts, tl), o_ref VMEM (bn, ts, tl)
    # ragged  path: x_ref VMEM (bn, C, tm),     o_ref VMEM (bn, 1, tm)
    C = x_ref.shape[1]
    s = x_ref[:, 0].astype(jnp.float32) * params_ref[0] + params_ref[C]
    for c in range(1, C):  # unrolled at trace time (C == 3)
        s = s + x_ref[:, c].astype(jnp.float32) * params_ref[c]
    y = jnp.tanh(jnp.tanh(s)).astype(o_ref.dtype)
    if len(o_ref.shape) == s.ndim:      # aligned path
        o_ref[...] = y
    else:                               # ragged path: drop the size-1 channel axis
        o_ref[:, 0, :] = y


def _choose_lane_tile(M):
    """Largest lane tile dividing M, preferring one that leaves rows >= 8."""
    cands = [c for c in (2048, 1024, 512, 256, 128) if M % c == 0]
    for c in cands:
        if M // c >= _SUB:
            return c
    return cands[-1]  # smallest candidate -> maximizes rows (less sublane padding)


def _choose_tiles_aligned(N, M):
    """(tl, rows, ts, bn) for the (N, C, rows, tl) layout (M % 128 == 0)."""
    tl = _choose_lane_tile(M)
    rows = M // tl
    ts_cap = max(_SUB, (_MAX_BLOCK_ELEMS // tl) // _SUB * _SUB)
    if rows <= ts_cap:
        ts = rows  # full second-minor dim: always layout-legal
        padded = _round_up(ts, _SUB) * tl          # VMEM elems incl. sublane pad
        bn = max(1, min(N, _MAX_BLOCK_ELEMS // padded))
    else:
        ts = ts_cap  # multiple of 8; ragged row tail is masked by the cdiv grid
        bn = 1
    # v7x: make sure the parallel grid has >= 2 programs when possible so both
    # TensorCores get work (no effect on v5e / v6e).
    if pl.cdiv(N, bn) == 1 and pl.cdiv(rows, ts) == 1:
        if N >= 2:
            bn = pl.cdiv(N, 2)
        elif rows > _SUB:
            ts = min(ts, _round_up(pl.cdiv(rows, 2), _SUB))
    return tl, rows, ts, bn


def _choose_tiles_flat(N, M):
    """(tm, bn) for the flat (N, C, M) layout (ragged M, rare)."""
    # C=3 / out=1 get padded to 8 sublanes per tile -> ~4x VMEM vs HBM bytes,
    # so use a quarter of the normal budget.
    budget = _MAX_BLOCK_ELEMS // 4
    if M < _LANE:
        tm = M  # full dim: layout-legal
    else:
        tm = min((M // _LANE) * _LANE, max(_LANE, (budget // _LANE) * _LANE))
    bn = max(1, min(N, budget // tm))
    if pl.cdiv(N, bn) == 1 and pl.cdiv(M, tm) == 1 and N >= 2:
        bn = pl.cdiv(N, 2)   # keep >= 2 programs for v7x
    return tm, bn


def _model_tanh_forward_impl(x_nchw, weight, bias):
    """x_nchw: (N, 3, H, W) -> (N, 1, H, W); output in x's dtype."""
    N, C, H, W = x_nchw.shape
    M = H * W
    out_dtype = x_nchw.dtype

    # [w_0, w_1, w_2, b] as f32 scalars, prefetched into SMEM.
    params = jnp.concatenate(
        [weight.reshape(C), bias.reshape(1)]).astype(jnp.float32)

    cost = pl.CostEstimate(
        flops=6 * N * M,
        transcendentals=2 * N * M,
        bytes_accessed=(C + 1) * N * M * x_nchw.dtype.itemsize,
    )
    cparams = pltpu.CompilerParams(
        dimension_semantics=("parallel", "parallel"))

    if M % _LANE == 0:
        tl, rows, ts, bn = _choose_tiles_aligned(N, M)
        x = x_nchw.reshape(N, C, rows, tl)          # free view of contiguous NCHW
        grid = (pl.cdiv(N, bn), pl.cdiv(rows, ts))
        out = pl.pallas_call(
            _conv1x1_tanh_tanh_kernel,
            out_shape=jax.ShapeDtypeStruct((N, rows, tl), out_dtype),
            grid_spec=pltpu.PrefetchScalarGridSpec(
                num_scalar_prefetch=1,
                grid=grid,
                in_specs=[pl.BlockSpec((bn, C, ts, tl),
                                       lambda nb, r, p: (nb, 0, r, 0))],
                out_specs=pl.BlockSpec((bn, ts, tl),
                                       lambda nb, r, p: (nb, r, 0)),
            ),
            compiler_params=cparams,
            cost_estimate=cost,
        )(params, x)
        return out.reshape(N, 1, H, W)

    # Ragged H*W: no pad / slice; flat M axis, boundary block store-masked.
    tm, bn = _choose_tiles_flat(N, M)
    x = x_nchw.reshape(N, C, M)                     # free view
    grid = (pl.cdiv(N, bn), pl.cdiv(M, tm))
    out = pl.pallas_call(
        _conv1x1_tanh_tanh_kernel,
        out_shape=jax.ShapeDtypeStruct((N, 1, M), out_dtype),
        grid_spec=pltpu.PrefetchScalarGridSpec(
            num_scalar_prefetch=1,
            grid=grid,
            in_specs=[pl.BlockSpec((bn, C, tm),
                                   lambda nb, mi, p: (nb, 0, mi))],
            out_specs=pl.BlockSpec((bn, 1, tm),
                                   lambda nb, mi, p: (nb, 0, mi)),
        ),
        compiler_params=cparams,
        cost_estimate=cost,
    )(params, x)
    return out.reshape(N, 1, H, W)


model_tanh_forward = jax.jit(_model_tanh_forward_impl)


def init_params(key, in_ch=3, out_ch=1):
    # Deterministic init mimicking torch.nn.Conv2d default (U(+/- 1/sqrt(fan_in))).
    kw, kb = jax.random.split(key)
    fan_in = in_ch  # 1x1 kernel
    bound = 1.0 / jnp.sqrt(fan_in)
    weight = jax.random.uniform(kw, (out_ch, in_ch, 1, 1), jnp.float32, -bound, bound)
    bias = jax.random.uniform(kb, (out_ch,), jnp.float32, -bound, bound)
    return weight, bias


if __name__ == "__main__":
    key = jax.random.PRNGKey(0)
    k_x, k_p = jax.random.split(key)

    N, C, H, W = 2, 3, 16, 16
    x = jax.random.normal(k_x, (N, C, H, W), jnp.float32)
    weight, bias = init_params(k_p)

    y = model_tanh_forward(x, weight, bias)
    y = jax.block_until_ready(y)

    # Pure-JAX reference (1x1 conv == channel contraction), tanh twice.
    ref = jnp.tanh(jnp.tanh(
        jnp.einsum('nchw,oc->nohw', x, weight.reshape(1, C))
        + bias.reshape(1, 1, 1, 1)))
    assert y.shape == (N, 1, H, W)
    assert jnp.allclose(y, ref, atol=1e-5, rtol=1e-5)

    print("KERNEL_OK")
</pallas_src>

<mosaic_0001>
module attributes {stable_mosaic.version = 11 : i64} {
  func.func @_conv1x1_tanh_tanh_kernel(%arg0: i32, %arg1: i32, %arg2: memref<4xf32, #tpu.memory_space<smem>>, %arg3: memref<1x3x2x128xf32, #tpu.memory_space<vmem>>, %arg4: memref<1x2x128xf32, #tpu.memory_space<vmem>>) attributes {dimension_semantics = [#tpu.dimension_semantics<parallel>, #tpu.dimension_semantics<parallel>], iteration_bounds = array<i64: 2, 1>, scalar_prefetch = 1 : i64, scratch_operands = 0 : i64, tpu.core_type = #tpu.core_type<tc>, window_params = [{transform_indices = @transform_0, window_bounds = array<i64: 1, 3, 2, 128>}, {transform_indices = @transform_1, window_bounds = array<i64: 1, 2, 128>}]} {
    %c0 = arith.constant 0 : index
    %c0_0 = arith.constant 0 : index
    %c0_1 = arith.constant 0 : index
    %c0_2 = arith.constant 0 : index
    %0 = vector.load %arg3[%c0, %c0_0, %c0_1, %c0_2] : memref<1x3x2x128xf32, #tpu.memory_space<vmem>>, vector<1x1x2x128xf32>
    %1 = vector.shape_cast %0 : vector<1x1x2x128xf32> to vector<1x2x128xf32>
    %c0_3 = arith.constant 0 : index
    %2 = memref.load %arg2[%c0_3] : memref<4xf32, #tpu.memory_space<smem>>
    %3 = vector.broadcast %2 : f32 to vector<1x2x128xf32>
    %4 = arith.mulf %1, %3 : vector<1x2x128xf32>
    %c3 = arith.constant 3 : index
    %5 = memref.load %arg2[%c3] : memref<4xf32, #tpu.memory_space<smem>>
    %6 = vector.broadcast %5 : f32 to vector<1x2x128xf32>
    %7 = arith.addf %4, %6 : vector<1x2x128xf32>
    %c0_4 = arith.constant 0 : index
    %c1 = arith.constant 1 : index
    %c0_5 = arith.constant 0 : index
    %c0_6 = arith.constant 0 : index
    %8 = vector.load %arg3[%c0_4, %c1, %c0_5, %c0_6] : memref<1x3x2x128xf32, #tpu.memory_space<vmem>>, vector<1x1x2x128xf32>
    %9 = vector.shape_cast %8 : vector<1x1x2x128xf32> to vector<1x2x128xf32>
    %c1_7 = arith.constant 1 : index
    %10 = memref.load %arg2[%c1_7] : memref<4xf32, #tpu.memory_space<smem>>
    %11 = vector.broadcast %10 : f32 to vector<1x2x128xf32>
    %12 = arith.mulf %9, %11 : vector<1x2x128xf32>
    %13 = arith.addf %7, %12 : vector<1x2x128xf32>
    %c0_8 = arith.constant 0 : index
    %c2 = arith.constant 2 : index
    %c0_9 = arith.constant 0 : index
    %c0_10 = arith.constant 0 : index
    %14 = vector.load %arg3[%c0_8, %c2, %c0_9, %c0_10] : memref<1x3x2x128xf32, #tpu.memory_space<vmem>>, vector<1x1x2x128xf32>
    %15 = vector.shape_cast %14 : vector<1x1x2x128xf32> to vector<1x2x128xf32>
    %c2_11 = arith.constant 2 : index
    %16 = memref.load %arg2[%c2_11] : memref<4xf32, #tpu.memory_space<smem>>
    %17 = vector.broadcast %16 : f32 to vector<1x2x128xf32>
    %18 = arith.mulf %15, %17 : vector<1x2x128xf32>
    %19 = arith.addf %13, %18 : vector<1x2x128xf32>
    %20 = math.tanh %19 : vector<1x2x128xf32>
    %21 = math.tanh %20 : vector<1x2x128xf32>
    %c0_12 = arith.constant 0 : index
    %c0_13 = arith.constant 0 : index
    %c0_14 = arith.constant 0 : index
    %22 = vector.load %arg4[%c0_12, %c0_13, %c0_14] : memref<1x2x128xf32, #tpu.memory_space<vmem>>, vector<1x2x128xf32>
    tpu.vector_store %arg4[%c0_12, %c0_13, %c0_14], %21 {strides = array<i32>} : memref<1x2x128xf32, #tpu.memory_space<vmem>>, vector<1x2x128xf32>,
    return
  }
  func.func @transform_0(%arg0: i32, %arg1: i32, %arg2: memref<4xf32, #tpu.memory_space<smem>>) -> (i32, i32, i32, i32) {
    %c0_i32 = arith.constant 0 : i32
    %c0_i32_0 = arith.constant 0 : i32
    %c0_i32_1 = arith.constant 0 : i32
    return %arg0, %c0_i32, %arg1, %c0_i32_0 : i32, i32, i32, i32
  }
  func.func @transform_1(%arg0: i32, %arg1: i32, %arg2: memref<4xf32, #tpu.memory_space<smem>>) -> (i32, i32, i32) {
    %c0_i32 = arith.constant 0 : i32
    %c0_i32_0 = arith.constant 0 : i32
    return %arg0, %arg1, %c0_i32 : i32, i32, i32
  }
}

</mosaic_0001>

<bundles_post_ra>
// kernel: _model_tanh_forward_impl.1
= control target key start
LH: loop header
LB: loop body
LE: loop exit
PB: predicated region body
PF: predicated region fallthrough
CT: control target
= control target key end

     0   :  { %s386_s0 = inlined_call_operand.vmem [shape: f32[4], index: 0, kind: input, shape index: {}]   ;;  %s387_s1 = inlined_call_operand.vmem [shape: f32[2,3,2,128], index: 1, kind: input, shape index: {}]   ;;  %s388_s2 = inlined_call_operand.vmem [shape: f32[2,2,128], index: 2, kind: output, shape index: {}]  }
   0x1   :  { %s7_s11 = sshll.u32 %s386_s0, 4  ;;  %s8_s11 = int_to_ptr.vmem [resolvable:$true] %s7_s11 }
   0x2   :  { %s296_s12 = scalar_lea.vmem %s8_s11, 16  ;;  %p301_p1 = scmp.lt.s32.totalorder %s8_s11, %s8_s11 }
   0x3   :  { %p297_p0 = scmp.ne.s32.totalorder %s8_s11, %s296_s12  ;;  %p302_p2 = scmp.lt.s32.totalorder %s296_s12, %s296_s12 }
   0x5   :  { %p303_p3 = por %p302_p2, %p301_p1 }
   0x7   :  { %p304_p4 = pnand %p303_p3, %p297_p0 }
   0x9   :  { %307 = shalt.err (!%p304_p4)  }
   0xa   :  { %s334_s13 = smov [#allocation3]  }
   0xb   :  { %10 = dma.vmem_to_smem %s8_s11, 16, %s334_s13, [#allocation2] }
   0xc   :  { %320 = dma.done.wait [#allocation2], 16 }
   0xd   :  { %321 = vsyncadd [#allocation2], 4294967280 }
   0xe   :  { %12 = sfence }
   0xf   :  { %s353_s14 = smov 0   ;;  %s355_s15 = smov 0  }
  0x10   :  { %s357_s16 = smov 0  }
  0x11 LB: > { %s30_s0 = sadd.s32 1, %s328_s15  ;;  %p256_p5 = scmp.ge.s32.totalorder %s332_s16, 1  ;;  %s332_s16 = sphi %s357_s16, %s18_s16   ;;  %s328_s15 = sphi %s355_s15, %s390_s15   ;;  %s324_s14 = sphi %s353_s14, %s389_s14  }
  0x12   : > { %p32_p6 = scmp.ge.s32.totalorder %s30_s0, 2  ;;  %p113_p7 = scmp.lt.s32.totalorder %s332_s16, 3 }
  0x14   : > { %s392_s0 = smov (%p32_p6, %s30_s0), 0  ;;  %p114_p8 = pnand %p256_p5, %p113_p7 }
  0x15   : > { %p138_p9 = scmp.lt.s32.totalorder (!%p114_p8), %s324_s14, 1  ;;  %s154_s17 = sld [smem:[#allocation3]] (!%p114_p8) }
  0x16   : > { %117 = sbr.rel (%p114_p8) target bundleno = 65 (0x41), region = 24  ;;  %s259_s18 = sld [smem:[#allocation3 + $0x3]] (!%p114_p8) }
  0x17   : > { %s261_s19 = sld [smem:[#allocation3 + $0x1]] (!%p114_p8)  ;;  %s263_s20 = sld [smem:[#allocation3 + $0x2]] (!%p114_p8) }
  0x1b   : > { %v155_v0 = vstv (!%p114_p8), %s154_s17 }
  0x1c   : > { %v158_v2 = vstv (!%p114_p8), %s259_s18 }
  0x1d   : > { %s394_s14 = smov (!%p138_p9, %s324_s14), 1  ;;  %v163_v4 = vstv %s261_s19  ;;  %v169_v8 = vstv %s263_s20 }
  0x1e   : > { %s266_s21 = smul.u32 6, %s394_s14  ;;  %s258_s25 = sshll.u32 %s394_s14, 1 }
  0x1f   : > { %s152_s28 = scalar_lea.vmem %s388_s2, %s258_s25 }
  0x20   : > { %s145_s24 = scalar_lea.vmem %s387_s1, %s266_s21 }
  0x21   : > { %v153_v1 = vld [vmem:[%s145_s24] sm:$0x3]  ;;  %v260_v3 = vld [vmem:[%s145_s24 + $0x2] sm:$0x3]  ;;  %v262_v7 = vld [vmem:[%s145_s24 + $0x4] sm:$0x3] }
  0x22   : > { %v156_v5 = vmul.f32 %v155_v0, %v153_v1  ;;  %v164_v6 = vmul.f32 %v260_v3, %v163_v4  ;;  %v170_v10 = vmul.f32 %v262_v7, %v169_v8 }
  0x24   : > { %v159_v9 = vadd.f32 %v158_v2, %v156_v5 }
  0x26   : > { %v165_v11 = vadd.f32 %v164_v6, %v159_v9 }
  0x28   : > { %v171_v12 = vadd.f32 %v170_v10, %v165_v11 }
  0x2a   : > { %292 = vtanh.f32 %v171_v12 }
  0x34   : > { %v293_v13 = vpop.eup %292 }
  0x35   : > { %294 = vtanh.f32 %v293_v13 }
  0x3f   : > { %v295_v14 = vpop.eup %294 }
  0x40   : > { %174 = vst [vmem:[%s152_s28] sm:$0x3] %v295_v14 }
  0x41 PF: > { %s18_s16 = sadd.s32 1, %s332_s16   ;;  %s389_s14 = smov %s328_s15 }
  0x42   : > { %p15_p10 = scmp.ge.s32.totalorder %s18_s16, 4   ;;  %s390_s15 = smov %s392_s0 }
  0x44   :  { %17 = sbr.rel (!%p15_p10) target bundleno = 17 (0x11), region = 56 }

</bundles_post_ra>
